<compile_context>
chip_gen: v7x
topology: tpu7x:2x2x1
jax: 0.10.0
libtpu: 0.0.40
codegen_flags: <defaults>
</compile_context>

<pallas_src>
import math
from functools import partial

import jax
import jax.numpy as jnp
from jax import lax
from jax.experimental import pallas as pl
from jax.experimental.pallas import tpu as pltpu


# ---------------------------------------------------------------------------
# Path 1: VMEM-resident table, one-hot matmul gather (small vocab).
# ---------------------------------------------------------------------------
def _embed_onehot_kernel(ids_ref,      # VMEM [TB, 1] int32 (this block's ids)
                         table_ref,    # VMEM [V, D]   (whole table, resident)
                         o_ref,        # VMEM [TB, D]
                         *, vocab, scale):
    tb = o_ref.shape[0]
    # one_hot[t, v] = (ids[t] == v); (TB,1) broadcast against lane-varying iota.
    iota = lax.broadcasted_iota(jnp.int32, (tb, vocab), 1)
    one_hot = (ids_ref[...] == iota).astype(table_ref.dtype)
    # Row gather as an MXU matmul; accumulate in f32, fuse the sqrt(d) scale.
    out = jnp.dot(one_hot, table_ref[...], preferred_element_type=jnp.float32)
    o_ref[...] = (out * scale).astype(o_ref.dtype)


# ---------------------------------------------------------------------------
# Path 2: HBM-resident table, manual row-gather DMAs straight into o_ref.
# ---------------------------------------------------------------------------
def _embed_gather_kernel(ids_ref,      # SMEM [N_pad] int32 (scalar-prefetched)
                         table_hbm,    # ANY  [V, D]  (embedding table in HBM)
                         o_ref,        # VMEM [TB, D] (output block; DMA target)
                         sems,         # DMA semaphores (window,)
                         *, tokens_per_block, scale, window):
    tb = tokens_per_block
    base = pl.program_id(0) * tb

    def _issue(t):
        tok = ids_ref[base + t]
        pltpu.make_async_copy(
            table_hbm.at[pl.ds(tok, 1)],
            o_ref.at[pl.ds(t, 1)],
            sems.at[t % window],
        ).start()

    def _wait(t):
        # Only dst shape + semaphore matter for the wait; src slice is a dummy.
        pltpu.make_async_copy(
            table_hbm.at[pl.ds(0, 1)],
            o_ref.at[pl.ds(t, 1)],
            sems.at[t % window],
        ).wait()

    # Prologue: fill the sliding window of outstanding row DMAs.
    lax.fori_loop(0, window,
                  lambda t, c: (_issue(t), c)[1], 0, unroll=True)

    # Steady state: retire row t, immediately issue row t + window.
    steady = tb - window
    unroll_steady = 8 if (steady % 8 == 0 and steady > 0) else 1

    def _steady(t, c):
        _wait(t)
        _issue(t + window)
        return c

    lax.fori_loop(0, steady, _steady, 0, unroll=unroll_steady)

    # Drain the remaining in-flight copies.
    lax.fori_loop(steady, tb,
                  lambda t, c: (_wait(t), c)[1], 0, unroll=True)

    # Fused * sqrt(d_model) epilogue (f32 math -> table dtype; v5e-safe).
    o_ref[...] = (o_ref[...].astype(jnp.float32) * scale).astype(o_ref.dtype)


# ---------------------------------------------------------------------------
# Wrapper
# ---------------------------------------------------------------------------
def embeddings(ids, table, *, tokens_per_block=128,
               vmem_table_bytes=4 << 20, force_hbm_gather=False):
    """Pallas equivalent of `Embeddings.forward`: table[ids] * sqrt(d_model).

    ids   : integer array of any shape (e.g. [B, T])
    table : [vocab, d_model]
    returns ids.shape + (d_model,)
    """
    V, D = table.shape
    lead_shape = ids.shape
    flat = ids.reshape(-1).astype(jnp.int32)
    n = flat.shape[0]
    tb = int(tokens_per_block)
    n_pad = pl.cdiv(n, tb) * tb
    if n_pad != n:
        # Pad with token 0 (harmless extra rows, trimmed after the call).
        flat = jnp.concatenate([flat, jnp.zeros((n_pad - n,), jnp.int32)])
    n_blocks = n_pad // tb
    scale = math.sqrt(D)

    table_bytes = V * D * jnp.dtype(table.dtype).itemsize
    use_vmem_table = (not force_hbm_gather) and table_bytes <= vmem_table_bytes

    if use_vmem_table:
        # ---- Fast path: whole table resident in VMEM, one-hot MXU gather. ----
        ids_col = flat.reshape(n_pad, 1)
        kernel = partial(_embed_onehot_kernel, vocab=V, scale=scale)
        out_flat = pl.pallas_call(
            kernel,
            out_shape=jax.ShapeDtypeStruct((n_pad, D), table.dtype),
            grid_spec=pltpu.PrefetchScalarGridSpec(
                num_scalar_prefetch=0,
                grid=(n_blocks,),
                in_specs=[
                    pl.BlockSpec((tb, 1), lambda i: (i, 0)),   # this block's ids
                    pl.BlockSpec((V, D), lambda i: (0, 0)),    # whole table
                ],
                out_specs=pl.BlockSpec((tb, D), lambda i: (i, 0)),
            ),
            compiler_params=pltpu.CompilerParams(
                dimension_semantics=("parallel",)),
        )(ids_col, table)
    else:
        # ---- Large-vocab path: HBM row gather, direct into output block. ----
        window = min(16, tb)                 # outstanding DMAs / sem pool size
        kernel = partial(_embed_gather_kernel,
                         tokens_per_block=tb, scale=scale, window=window)
        out_flat = pl.pallas_call(
            kernel,
            out_shape=jax.ShapeDtypeStruct((n_pad, D), table.dtype),
            grid_spec=pltpu.PrefetchScalarGridSpec(
                num_scalar_prefetch=1,                        # flat ids -> SMEM
                grid=(n_blocks,),
                in_specs=[pl.BlockSpec(memory_space=pl.ANY)],  # table stays HBM
                out_specs=pl.BlockSpec((tb, D), lambda i, ids: (i, 0)),
                scratch_shapes=[pltpu.SemaphoreType.DMA((window,))],
            ),
            compiler_params=pltpu.CompilerParams(
                dimension_semantics=("parallel",)),
        )(flat, table)

    return out_flat[:n].reshape(*lead_shape, D)


# ---------------------------------------------------------------------------
if __name__ == "__main__":
    B, T, V, D = 2, 8, 512, 128   # D multiple of 128 -> lane-dense stores

    key = jax.random.PRNGKey(0)
    k_ids, k_tab = jax.random.split(key)
    ids = jax.random.randint(k_ids, (B, T), 0, V, dtype=jnp.int32)
    table = jax.random.normal(k_tab, (V, D), jnp.float32)

    # Pure-JAX reference: lut(x) * sqrt(d_model)
    ref = table[ids] * math.sqrt(D)

    # Fast path (table is only 256 KiB -> VMEM-resident one-hot gather).
    out_fast = jax.block_until_ready(embeddings(ids, table))
    assert out_fast.shape == (B, T, D) and out_fast.dtype == table.dtype
    assert bool(jnp.all(jnp.isfinite(out_fast)))
    assert bool(jnp.allclose(out_fast, ref, atol=1e-5, rtol=1e-5))

    # Large-vocab (HBM row-gather) path, exercised explicitly at small shapes.
    out_hbm = jax.block_until_ready(
        embeddings(ids, table, force_hbm_gather=True))
    assert out_hbm.shape == (B, T, D) and out_hbm.dtype == table.dtype
    assert bool(jnp.allclose(out_hbm, ref, atol=1e-5, rtol=1e-5))

    print("KERNEL_OK")
</pallas_src>

<mosaic_0001>
module attributes {stable_mosaic.version = 11 : i64} {
  func.func @_embed_onehot_kernel(%arg0: i32, %arg1: memref<128x1xi32, #tpu.memory_space<vmem>>, %arg2: memref<512x128xf32, #tpu.memory_space<vmem>>, %arg3: memref<128x128xf32, #tpu.memory_space<vmem>>) attributes {dimension_semantics = [#tpu.dimension_semantics<parallel>], iteration_bounds = array<i64: 1>, scalar_prefetch = 0 : i64, scratch_operands = 0 : i64, tpu.core_type = #tpu.core_type<tc>, window_params = [{transform_indices = @transform_0, window_bounds = array<i64: 128, 1>}, {pipeline_mode = #tpu.pipeline_mode<synchronous>, transform_indices = @transform_1, window_bounds = array<i64: 512, 128>}, {transform_indices = @transform_2, window_bounds = array<i64: 128, 128>}]} {
    %0 = tpu.iota {dimensions = array<i32: 1>} : vector<128x512xi32>
    %c0 = arith.constant 0 : index
    %c0_0 = arith.constant 0 : index
    %1 = vector.load %arg1[%c0, %c0_0] : memref<128x1xi32, #tpu.memory_space<vmem>>, vector<128x1xi32>
    %2 = vector.broadcast %1 : vector<128x1xi32> to vector<128x512xi32>
    %3 = arith.cmpi eq, %2, %0 : vector<128x512xi32>
    %4 = arith.extui %3 : vector<128x512xi1> to vector<128x512xi32>
    %5 = arith.sitofp %4 : vector<128x512xi32> to vector<128x512xf32>
    %c0_1 = arith.constant 0 : index
    %c0_2 = arith.constant 0 : index
    %6 = vector.load %arg2[%c0_1, %c0_2] : memref<512x128xf32, #tpu.memory_space<vmem>>, vector<512x128xf32>
    %cst = arith.constant dense<0.000000e+00> : vector<128x128xf32>
    %7 = tpu.matmul %5, %6, %cst {dimension_numbers = #tpu.dot_dimension_numbers<[1], [0], [0], [1], [0, 0, 1, 1], [], []>} : vector<128x512xf32>, vector<512x128xf32>, vector<128x128xf32> -> vector<128x128xf32>
    %cst_3 = arith.constant 11.3137083 : f32
    %8 = vector.broadcast %cst_3 : f32 to vector<128x128xf32>
    %9 = arith.mulf %7, %8 : vector<128x128xf32>
    %c0_4 = arith.constant 0 : index
    %c0_5 = arith.constant 0 : index
    %10 = vector.load %arg3[%c0_4, %c0_5] : memref<128x128xf32, #tpu.memory_space<vmem>>, vector<128x128xf32>
    tpu.vector_store %arg3[%c0_4, %c0_5], %9 {strides = array<i32>} : memref<128x128xf32, #tpu.memory_space<vmem>>, vector<128x128xf32>,
    return
  }
  func.func @transform_0(%arg0: i32) -> (i32, i32) {
    %c0_i32 = arith.constant 0 : i32
    %c0_i32_0 = arith.constant 0 : i32
    return %arg0, %c0_i32 : i32, i32
  }
  func.func @transform_1(%arg0: i32) -> (i32, i32) {
    %c0_i32 = arith.constant 0 : i32
    %c0_i32_0 = arith.constant 0 : i32
    %c0_i32_1 = arith.constant 0 : i32
    return %c0_i32, %c0_i32_0 : i32, i32
  }
  func.func @transform_2(%arg0: i32) -> (i32, i32) {
    %c0_i32 = arith.constant 0 : i32
    %c0_i32_0 = arith.constant 0 : i32
    return %arg0, %c0_i32 : i32, i32
  }
}

</mosaic_0001>

<bundles_post_ra>
// kernel: tpu_custom_call.1
= control target key start
LH: loop header
LB: loop body
LE: loop exit
PB: predicated region body
PF: predicated region fallthrough
CT: control target
= control target key end

     0   :  { %7 = vsyncpa [#allocation3], 0  ;;  %s1336_s0 = inlined_call_operand.vmem [shape: s32[128,1], index: 0, kind: input, shape index: {}]   ;;  %s1337_s1 = inlined_call_operand.hbm [shape: f32[512,128], index: 1, kind: input, shape index: {}]   ;;  %s1338_s2 = inlined_call_operand.hbm [shape: f32[128,128], index: 2, kind: output, shape index: {}]  }
   0x1   :  { %8 = vsyncpa [#allocation4], 0  ;;  %s1098_s9 = smov [#allocation2]   ;;  %s1050_s13 = scalar_lea.hbm %s1337_s1, 8192 }
   0x2   :  { %s16_s10 = sshll.u32 %s1098_s9, 4  ;;  %p1051_p0 = scmp.ne.s32.totalorder %s1337_s1, %s1050_s13  ;;  %s17_s10 = int_to_ptr.vmem [resolvable:$true] %s16_s10 }
   0x3   :  { %p1054_p1 = scmp.lt.u32.totalorder %s1050_s13, %s1337_s1 }
   0x5   :  { %p1056_p2 = pnand %p1054_p1, %p1051_p0 }
   0x7   :  { %1059 = shalt.err (!%p1056_p2)
}
   0x8   :  { %s1060_s18 = scalar_lea.vmem %s17_s10, 8192  ;;  %p1065_p4 = scmp.lt.s32.totalorder %s17_s10, %s17_s10 }
   0x9   :  { %p1061_p3 = scmp.ne.s32.totalorder %s17_s10, %s1060_s18  ;;  %p1066_p5 = scmp.lt.s32.totalorder %s1060_s18, %s1060_s18 }
   0xb   :  { %p1067_p6 = por %p1066_p5, %p1065_p4 }
   0xd   :  { %p1068_p7 = pnand %p1067_p6, %p1061_p3 }
   0xf   :  { %1071 = shalt.err (!%p1068_p7)
}
  0x10   :  { %s1099_s19 = smov 128   ;;  %s1100_s20 = smov 8  }
  0x11   :  { %22 = dma.hbm_to_vmem [thread:$0]  %s1337_s1, 8192, %s17_s10, [#allocation3], %s1099_s19, %s1099_s19, %s1100_s20  }
  0x12   :  { %1094 = dma.done.wait [#allocation3], 8192  }
  0x13   :  { %1095 = vsyncadd [#allocation3], 4294959104  ;;  %v1101_v0 = vmov 0   ;;  %v33_v1 = vld [vmem:[%s1336_s0 + $0x10] sm:$0xff]  ;;  %v31_v2 = vld [vmem:[%s1336_s0] sm:$0xff] }
  0x14   :  { %1049 = vset.pattern.permute.xlu1 %v1101_v0  ;;  %1048 = vset.pattern.permute.xlu0 %v1101_v0  ;;  %v34_v3 = vld [vmem:[%s1336_s0 + $0x18] sm:$0xff]  ;;  %v32_v4 = vld [vmem:[%s1336_s0 + $0x8] sm:$0xff]  ;;  %v35_v6 = vld [vmem:[%s1336_s0 + $0x20] sm:$0xff] }
  0x15   :  { %54 = vperm.xlu1 %1049, %v33_v1   ;;  %48 = vperm.xlu0 %1048, %v31_v2   ;;  %v36_v5 = vld [vmem:[%s1336_s0 + $0x28] sm:$0xff]  ;;  %v303_v7 = vld [vmem:[#allocation2 + $0x80] sm:$0xff]  ;;  %v38_v17 = vld [vmem:[%s1336_s0 + $0x38] sm:$0xff] }
  0x16   :  { %v304_v8 = vld [vmem:[#allocation2 + $0x88] sm:$0xff]  ;;  %v335_v10 = vld [vmem:[#allocation2 + $0x180] sm:$0xff]  ;;  %v37_v18 = vld [vmem:[%s1336_s0 + $0x30] sm:$0xff] }
  0x17   :  { %v978_v9 = vpack.c.bf16 %v304_v8, %v303_v7  ;;  %v336_v11 = vld [vmem:[#allocation2 + $0x188] sm:$0xff]  ;;  %v287_v12 = vld [vmem:[#allocation2] sm:$0xff]  ;;  %v305_v21 = vld [vmem:[#allocation2 + $0x90] sm:$0xff] }
  0x18   :  { %v1010_v13 = vpack.c.bf16 %v336_v11, %v335_v10  ;;  %v288_v14 = vld [vmem:[#allocation2 + $0x8] sm:$0xff]  ;;  %v319_v15 = vld [vmem:[#allocation2 + $0x100] sm:$0xff]  ;;  %v306_v22 = vld [vmem:[#allocation2 + $0x98] sm:$0xff] }
  0x19   :  { %57 = vperm.xlu1 %1049, %v34_v3   ;;  %51 = vperm.xlu0 %1048, %v32_v4   ;;  %v320_v16 = vld [vmem:[#allocation2 + $0x108] sm:$0xff]  ;;  %v980_v19 = vpack.c.bf16 %v288_v14, %v287_v12  ;;  %v337_v23 = vld [vmem:[#allocation2 + $0x190] sm:$0xff]  ;;  %v982_v24 = vpack.c.bf16 %v306_v22, %v305_v21  ;;  %v338_v25 = vld [vmem:[#allocation2 + $0x198] sm:$0xff] }
  0x1a   :  { %979 = vmatprep.subr.bf16.mxu0 %v978_v9  ;;  %v1012_v20 = vpack.c.bf16 %v320_v16, %v319_v15  ;;  %v289_v26 = vld [vmem:[#allocation2 + $0x10] sm:$0xff]  ;;  %v290_v27 = vld [vmem:[#allocation2 + $0x18] sm:$0xff]  ;;  %1011 = vmatprep.subr.bf16.mxu1 %v1010_v13  ;;  %v1014_v28 = vpack.c.bf16 %v338_v25, %v337_v23  ;;  %v307_v32 = vld [vmem:[#allocation2 + $0xa0] sm:$0xff] }
  0x1b   :  { %981 = vmatpush3.bf16.msra.mxu0 %v980_v19  ;;  %v984_v29 = vpack.c.bf16 %v290_v27, %v289_v26  ;;  %v321_v30 = vld [vmem:[#allocation2 + $0x110] sm:$0xff]  ;;  %v322_v31 = vld [vmem:[#allocation2 + $0x118] sm:$0xff]  ;;  %v308_v34 = vld [vmem:[#allocation2 + $0xa8] sm:$0xff] }
  0x1c   :  { %1013 = vmatpush3.bf16.msra.mxu1 %v1012_v20  ;;  %983 = vmatprep.subr.bf16.mxu0 %v982_v24  ;;  %v1016_v33 = vpack.c.bf16 %v322_v31, %v321_v30  ;;  %v339_v35 = vld [vmem:[#allocation2 + $0x1a0] sm:$0xff]  ;;  %v340_v36 = vld [vmem:[#allocation2 + $0x1a8] sm:$0xff]  ;;  %v986_v38 = vpack.c.bf16 %v308_v34, %v307_v32  ;;  %v309_v44 = vld [vmem:[#allocation2 + $0xb0] sm:$0xff] }
  0x1d   :  { %63 = vperm.xlu1 %1049, %v36_v5   ;;  %60 = vperm.xlu0 %1048, %v35_v6   ;;  %v40_v37 = vld [vmem:[%s1336_s0 + $0x48] sm:$0xff]  ;;  %v1018_v39 = vpack.c.bf16 %v340_v36, %v339_v35  ;;  %v291_v40 = vld [vmem:[#allocation2 + $0x20] sm:$0xff]  ;;  %v310_v45 = vld [vmem:[#allocation2 + $0xb8] sm:$0xff] }
  0x1e   :  { %1015 = vmatprep.subr.bf16.mxu1 %v1014_v28  ;;  %v292_v41 = vld [vmem:[#allocation2 + $0x28] sm:$0xff]  ;;  %v323_v42 = vld [vmem:[#allocation2 + $0x120] sm:$0xff]  ;;  %v341_v48 = vld [vmem:[#allocation2 + $0x1b0] sm:$0xff]  ;;  %v990_v51 = vpack.c.bf16 %v310_v45, %v309_v44 }
  0x1f   :  { %v324_v43 = vld [vmem:[#allocation2 + $0x128] sm:$0xff]  ;;  %v39_v46 = vld [vmem:[%s1336_s0 + $0x40] sm:$0xff]  ;;  %985 = vmatpush3.bf16.msra.mxu0 %v984_v29  ;;  %v988_v47 = vpack.c.bf16 %v292_v41, %v291_v40  ;;  %v342_v49 = vld [vmem:[#allocation2 + $0x1b8] sm:$0xff] }
  0x20   :  { %1017 = vmatpush3.bf16.msra.mxu1 %v1016_v33  ;;  %987 = vmatprep.subr.bf16.mxu0 %v986_v38  ;;  %v1020_v50 = vpack.c.bf16 %v324_v43, %v323_v42  ;;  %v293_v52 = vld [vmem:[#allocation2 + $0x30] sm:$0xff]  ;;  %v294_v53 = vld [vmem:[#allocation2 + $0x38] sm:$0xff]  ;;  %v1022_v55 = vpack.c.bf16 %v342_v49, %v341_v48  ;;  %v311_v57 = vld [vmem:[#allocation2 + $0xc0] sm:$0xff]  ;;  %v26_v49 = vlaneseq }
  0x21   :  { %69 = vperm.xlu1 %1049, %v38_v17   ;;  %66 = vperm.xlu0 %1048, %v37_v18   ;;  %v325_v54 = vld [vmem:[#allocation2 + $0x130] sm:$0xff]  ;;  %v326_v56 = vld [vmem:[#allocation2 + $0x138] sm:$0xff]  ;;  %v312_v58 = vld [vmem:[#allocation2 + $0xc8] sm:$0xff]  ;;  %v992_v63 = vpack.c.bf16 %v294_v53, %v293_v52 }
  0x22   :  { %1019 = vmatprep.subr.bf16.mxu1 %v1018_v39  ;;  %v343_v59 = vld [vmem:[#allocation2 + $0x1c0] sm:$0xff]  ;;  %v344_v60 = vld [vmem:[#allocation2 + $0x1c8] sm:$0xff]  ;;  %v42_v61 = vld [vmem:[%s1336_s0 + $0x58] sm:$0xff]  ;;  %v1024_v0 = vpack.c.bf16 %v326_v56, %v325_v54  ;;  %v994_v1 = vpack.c.bf16 %v312_v58, %v311_v57 }
  0x23   :  { %v41_v62 = vld [vmem:[%s1336_s0 + $0x50] sm:$0xff]  ;;  %989 = vmatpush3.bf16.msra.mxu0 %v988_v47  ;;  %v295_v2 = vld [vmem:[#allocation2 + $0x40] sm:$0xff]  ;;  %v296_v3 = vld [vmem:[#allocation2 + $0x48] sm:$0xff]  ;;  %v1026_v5 = vpack.c.bf16 %v344_v60, %v343_v59 }
  0x24   :  { %1021 = vmatpush3.bf16.msra.mxu1 %v1020_v50  ;;  %991 = vmatprep.subr.bf16.mxu0 %v990_v51  ;;  %v327_v4 = vld [vmem:[#allocation2 + $0x140] sm:$0xff]  ;;  %v328_v6 = vld [vmem:[#allocation2 + $0x148] sm:$0xff]  ;;  %v313_v7 = vld [vmem:[#allocation2 + $0xd0] sm:$0xff]  ;;  %v996_v13 = vpack.c.bf16 %v296_v3, %v295_v2  ;;  %v1182_v50 = vand.u32 127, %v26_v49 }
  0x25   :  { %75 = vperm.xlu1 %1049, %v40_v37   ;;  %72 = vperm.xlu0 %1048, %v39_v46   ;;  %v314_v8 = vld [vmem:[#allocation2 + $0xd8] sm:$0xff]  ;;  %v345_v9 = vld [vmem:[#allocation2 + $0x1d0] sm:$0xff]  ;;  %v44_v11 = vld [vmem:[%s1336_s0 + $0x68] sm:$0xff]  ;;  %v1028_v14 = vpack.c.bf16 %v328_v6, %v327_v4 }
  0x26   :  { %1023 = vmatprep.subr.bf16.mxu1 %v1022_v55  ;;  %v346_v10 = vld [vmem:[#allocation2 + $0x1d8] sm:$0xff]  ;;  %v43_v12 = vld [vmem:[%s1336_s0 + $0x60] sm:$0xff]  ;;  %v998_v15 = vpack.c.bf16 %v314_v8, %v313_v7  ;;  %v297_v16 = vld [vmem:[#allocation2 + $0x50] sm:$0xff]  ;;  %v1185_v51 = vadd.s32 128, %v1182_v50  ;;  %v1188_v52 = vadd.s32 384, %v1182_v50  ;;  %v1191_v53 = vadd.s32 256, %v1182_v50 }
  0x27   :  { %993 = vmatpush3.bf16.msra.mxu0 %v992_v63  ;;  %v298_v17 = vld [vmem:[#allocation2 + $0x58] sm:$0xff]  ;;  %v329_v18 = vld [vmem:[#allocation2 + $0x150] sm:$0xff]  ;;  %v1030_v19 = vpack.c.bf16 %v346_v10, %v345_v9  ;;  %v315_v21 = vld [vmem:[#allocation2 + $0xe0] sm:$0xff]  ;;  %v1102_v55 = vmov 1.0  }
  0x28   :  { %1025 = vmatpush3.bf16.msra.mxu1 %v1024_v0  ;;  %995 = vmatprep.subr.bf16.mxu0 %v994_v1  ;;  %v330_v20 = vld [vmem:[#allocation2 + $0x158] sm:$0xff]  ;;  %v316_v22 = vld [vmem:[#allocation2 + $0xe8] sm:$0xff]  ;;  %v347_v23 = vld [vmem:[#allocation2 + $0x1e0] sm:$0xff]  ;;  %v1000_v27 = vpack.c.bf16 %v298_v17, %v297_v16 }
  0x29   :  { %81 = vperm.xlu1 %1049, %v42_v61   ;;  %78 = vperm.xlu0 %1048, %v41_v62   ;;  %v348_v24 = vld [vmem:[#allocation2 + $0x1e8] sm:$0xff]  ;;  %v46_v25 = vld [vmem:[%s1336_s0 + $0x78] sm:$0xff]  ;;  %v45_v26 = vld [vmem:[%s1336_s0 + $0x70] sm:$0xff]  ;;  %v1032_v28 = vpack.c.bf16 %v330_v20, %v329_v18  ;;  %v1002_v29 = vpack.c.bf16 %v316_v22, %v315_v21  ;;  %s1103_s0 = smov [#allocation5]  }
  0x2a   :  { %1027 = vmatprep.subr.bf16.mxu1 %v1026_v5  ;;  %v299_v30 = vld [vmem:[#allocation2 + $0x60] sm:$0xff]  ;;  %v300_v31 = vld [vmem:[#allocation2 + $0x68] sm:$0xff]  ;;  %v1034_v33 = vpack.c.bf16 %v348_v24, %v347_v23  ;;  %v317_v35 = vld [vmem:[#allocation2 + $0xf0] sm:$0xff]  ;;  %s678_s28 = sshll.u32 %s1103_s0, 4  ;;  %s679_s28 = int_to_ptr.vmem [resolvable:$true] %s678_s28 }
  0x2b   :  { %997 = vmatpush3.bf16.msra.mxu0 %v996_v13  ;;  %v331_v32 = vld [vmem:[#allocation2 + $0x160] sm:$0xff]  ;;  %v332_v34 = vld [vmem:[#allocation2 + $0x168] sm:$0xff]  ;;  %v318_v36 = vld [vmem:[#allocation2 + $0xf8] sm:$0xff]  ;;  %v1004_v39 = vpack.c.bf16 %v300_v31, %v299_v30  ;;  %s1072_s1 = scalar_lea.vmem %s679_s28, 2048  ;;  %p1077_p9 = scmp.lt.s32.totalorder %s679_s28, %s679_s28 }
  0x2c   :  { %1029 = vmatpush3.bf16.msra.mxu1 %v1028_v14  ;;  %999 = vmatprep.subr.bf16.mxu0 %v998_v15  ;;  %v349_v37 = vld [vmem:[#allocation2 + $0x1f0] sm:$0xff]  ;;  %v350_v38 = vld [vmem:[#allocation2 + $0x1f8] sm:$0xff]  ;;  %v1036_v40 = vpack.c.bf16 %v332_v34, %v331_v32  ;;  %v1006_v41 = vpack.c.bf16 %v318_v36, %v317_v35  ;;  %p1073_p8 = scmp.ne.s32.totalorder %s679_s28, %s1072_s1  ;;  %p1078_p10 = scmp.lt.s32.totalorder %s1072_s1, %s1072_s1 }
  0x2d   :  { %87 = vperm.xlu1 %1049, %v44_v11   ;;  %84 = vperm.xlu0 %1048, %v43_v12   ;;  %v301_v42 = vld [vmem:[#allocation2 + $0x70] sm:$0xff]  ;;  %v302_v43 = vld [vmem:[#allocation2 + $0x78] sm:$0xff]  ;;  %v1038_v44 = vpack.c.bf16 %v350_v38, %v349_v37 }
  0x2e   :  { %1031 = vmatprep.subr.bf16.mxu1 %v1030_v19  ;;  %v333_v45 = vld [vmem:[#allocation2 + $0x170] sm:$0xff]  ;;  %v334_v46 = vld [vmem:[#allocation2 + $0x178] sm:$0xff]  ;;  %v1008_v47 = vpack.c.bf16 %v302_v43, %v301_v42  ;;  %p1079_p11 = por %p1078_p10, %p1077_p9 }
  0x2f   :  { %1001 = vmatpush3.bf16.msra.mxu0 %v1000_v27  ;;  %v1040_v48 = vpack.c.bf16 %v334_v46, %v333_v45 }
  0x30   :  { %1033 = vmatpush3.bf16.msra.mxu1 %v1032_v28  ;;  %1003 = vmatprep.subr.bf16.mxu0 %v1002_v29  ;;  %p1080_p12 = pnand %p1079_p11, %p1073_p8 }
  0x31   :  { %93 = vperm.xlu1 %1049, %v46_v25   ;;  %90 = vperm.xlu0 %1048, %v45_v26  }
  0x32   :  { %1035 = vmatprep.subr.bf16.mxu1 %v1034_v33 }
  0x33   :  { %1005 = vmatpush3.bf16.msra.mxu0 %v1004_v39 }
  0x34   :  { %1037 = vmatpush3.bf16.msra.mxu1 %v1036_v40  ;;  %1007 = vmatprep.subr.bf16.mxu0 %v1006_v41 }
  0x35   :  { %1039 = vmatprep.subr.bf16.mxu1 %v1038_v44 }
  0x37   :  { %1009 = vmatpush3.bf16.msra.mxu0 %v1008_v47 }
  0x38   :  { %1041 = vmatpush3.bf16.msra.mxu1 %v1040_v48 }
  0x94   :  { %v49_v54 = vpop.permute.xlu0 %48  ;;  %v55_v56 = vpop.permute.xlu1 %54 }
  0x95   :  { %vm96_vm0 = vcmp.eq.s32.totalorder %v49_v54, %v1185_v51  ;;  %vm98_vm1 = vcmp.eq.s32.totalorder %v49_v54, %v1188_v52  ;;  %vm95_vm2 = vcmp.eq.s32.totalorder %v49_v54, %v1182_v50  ;;  %vm97_vm3 = vcmp.eq.s32.totalorder %v49_v54, %v1191_v53 }
  0x96   :  { %754 = vmatprep.mubr.msk.f32.mxu0 %vm96_vm0, %v1102_v55  ;;  %786 = vmatprep.mubr.msk.f32.mxu1 %vm98_vm1, %v1102_v55  ;;  %vm104_vm4 = vcmp.eq.s32.totalorder %v55_v56, %v1185_v51  ;;  %vm106_vm5 = vcmp.eq.s32.totalorder %v55_v56, %v1188_v52  ;;  %vm103_vm10 = vcmp.eq.s32.totalorder %v55_v56, %v1182_v50 }
  0x97   :  { %755 = vmatmul.mubr.msk.f32.vlgmr.msra.gmra.mrb[0].mxu0 %vm95_vm2, %v1102_v55  ;;  %787 = vmatmul.mubr.msk.f32.vlgmr.msra.gmra.mrb[0].mxu1 %vm97_vm3, %v1102_v55  ;;  %vm105_vm11 = vcmp.eq.s32.totalorder %v55_v56, %v1191_v53 }
  0x98   :  { %v52_v57 = vpop.permute.xlu0 %51  ;;  %v58_v58 = vpop.permute.xlu1 %57 }
  0x99   :  { %vm100_vm6 = vcmp.eq.s32.totalorder %v52_v57, %v1185_v51  ;;  %vm102_vm7 = vcmp.eq.s32.totalorder %v52_v57, %v1188_v52  ;;  %vm99_vm8 = vcmp.eq.s32.totalorder %v52_v57, %v1182_v50  ;;  %vm101_vm9 = vcmp.eq.s32.totalorder %v52_v57, %v1191_v53 }
  0x9a   :  { %756 = vmatprep.mubr.msk.f32.mxu0 %vm100_vm6, %v1102_v55  ;;  %788 = vmatprep.mubr.msk.f32.mxu1 %vm102_vm7, %v1102_v55  ;;  %vm108_vm12 = vcmp.eq.s32.totalorder %v58_v58, %v1185_v51  ;;  %vm110_vm13 = vcmp.eq.s32.totalorder %v58_v58, %v1188_v52  ;;  %vm107_vm14 = vcmp.eq.s32.totalorder %v58_v58, %v1182_v50 }
  0x9b   :  { %757 = vmatmul.mubr.msk.f32.gmra.mrb[2].mxu0 %vm99_vm8, %v1102_v55  ;;  %789 = vmatmul.mubr.msk.f32.gmra.mrb[2].mxu1 %vm101_vm9, %v1102_v55  ;;  %vm109_vm15 = vcmp.eq.s32.totalorder %v58_v58, %v1191_v53 }
  0x9c   :  { %758 = vmatprep.mubr.msk.f32.mxu0 %vm104_vm4, %v1102_v55  ;;  %790 = vmatprep.mubr.msk.f32.mxu1 %vm106_vm5, %v1102_v55  ;;  %v61_v59 = vpop.permute.xlu0 %60  ;;  %v64_v60 = vpop.permute.xlu1 %63 }
  0x9d   :  { %vm112_vm0 = vcmp.eq.s32.totalorder %v61_v59, %v1185_v51  ;;  %vm114_vm1 = vcmp.eq.s32.totalorder %v61_v59, %v1188_v52  ;;  %vm111_vm2 = vcmp.eq.s32.totalorder %v61_v59, %v1182_v50  ;;  %vm113_vm3 = vcmp.eq.s32.totalorder %v61_v59, %v1191_v53 }
  0x9e   :  { %vm116_vm4 = vcmp.eq.s32.totalorder %v64_v60, %v1185_v51  ;;  %vm118_vm5 = vcmp.eq.s32.totalorder %v64_v60, %v1188_v52  ;;  %vm115_vm6 = vcmp.eq.s32.totalorder %v64_v60, %v1182_v50  ;;  %vm117_vm7 = vcmp.eq.s32.totalorder %v64_v60, %v1191_v53 }
  0x9f   :  { %759 = vmatmul.mubr.msk.f32.gmra.mrb[4].mxu0 %vm103_vm10, %v1102_v55  ;;  %791 = vmatmul.mubr.msk.f32.gmra.mrb[4].mxu1 %vm105_vm11, %v1102_v55 }
  0xa0   :  { %760 = vmatprep.mubr.msk.f32.mxu0 %vm108_vm12, %v1102_v55  ;;  %792 = vmatprep.mubr.msk.f32.mxu1 %vm110_vm13, %v1102_v55  ;;  %v67_v61 = vpop.permute.xlu0 %66  ;;  %v70_v62 = vpop.permute.xlu1 %69 }
  0xa1   :  { %vm120_vm8 = vcmp.eq.s32.totalorder %v67_v61, %v1185_v51  ;;  %vm122_vm9 = vcmp.eq.s32.totalorder %v67_v61, %v1188_v52  ;;  %vm119_vm10 = vcmp.eq.s32.totalorder %v67_v61, %v1182_v50  ;;  %vm121_vm11 = vcmp.eq.s32.totalorder %v67_v61, %v1191_v53 }
  0xa2   :  { %vm124_vm12 = vcmp.eq.s32.totalorder %v70_v62, %v1185_v51  ;;  %vm126_vm13 = vcmp.eq.s32.totalorder %v70_v62, %v1188_v52 }
  0xa3   :  { %761 = vmatmul.mubr.msk.f32.gmra.mrb[6].mxu0 %vm107_vm14, %v1102_v55  ;;  %793 = vmatmul.mubr.msk.f32.gmra.mrb[6].mxu1 %vm109_vm15, %v1102_v55  ;;  %vm123_vm14 = vcmp.eq.s32.totalorder %v70_v62, %v1182_v50  ;;  %vm125_vm15 = vcmp.eq.s32.totalorder %v70_v62, %v1191_v53 }
  0xa4   :  { %762 = vmatprep.mubr.msk.f32.mxu0 %vm112_vm0, %v1102_v55  ;;  %794 = vmatprep.mubr.msk.f32.mxu1 %vm114_vm1, %v1102_v55  ;;  %v73_v63 = vpop.permute.xlu0 %72  ;;  %v76_v0 = vpop.permute.xlu1 %75 }
  0xa5   :  { %vm128_vm0 = vcmp.eq.s32.totalorder %v73_v63, %v1185_v51  ;;  %vm130_vm1 = vcmp.eq.s32.totalorder %v73_v63, %v1188_v52 }
  0xa7   :  { %763 = vmatmul.mubr.msk.f32.gmra.mrb[8].mxu0 %vm111_vm2, %v1102_v55  ;;  %795 = vmatmul.mubr.msk.f32.gmra.mrb[8].mxu1 %vm113_vm3, %v1102_v55  ;;  %vm127_vm2 = vcmp.eq.s32.totalorder %v73_v63, %v1182_v50  ;;  %vm129_vm3 = vcmp.eq.s32.totalorder %v73_v63, %v1191_v53 }
  0xa8   :  { %764 = vmatprep.mubr.msk.f32.mxu0 %vm116_vm4, %v1102_v55  ;;  %796 = vmatprep.mubr.msk.f32.mxu1 %vm118_vm5, %v1102_v55  ;;  %vm132_vm4 = vcmp.eq.s32.totalorder %v76_v0, %v1185_v51  ;;  %vm134_vm5 = vcmp.eq.s32.totalorder %v76_v0, %v1188_v52  ;;  %v79_v1 = vpop.permute.xlu0 %78  ;;  %v82_v2 = vpop.permute.xlu1 %81 }
  0xab   :  { %765 = vmatmul.mubr.msk.f32.gmra.mrb[10].mxu0 %vm115_vm6, %v1102_v55  ;;  %797 = vmatmul.mubr.msk.f32.gmra.mrb[10].mxu1 %vm117_vm7, %v1102_v55  ;;  %vm131_vm6 = vcmp.eq.s32.totalorder %v76_v0, %v1182_v50  ;;  %vm133_vm7 = vcmp.eq.s32.totalorder %v76_v0, %v1191_v53 }
  0xac   :  { %766 = vmatprep.mubr.msk.f32.mxu0 %vm120_vm8, %v1102_v55  ;;  %798 = vmatprep.mubr.msk.f32.mxu1 %vm122_vm9, %v1102_v55  ;;  %vm136_vm8 = vcmp.eq.s32.totalorder %v79_v1, %v1185_v51  ;;  %vm138_vm9 = vcmp.eq.s32.totalorder %v79_v1, %v1188_v52  ;;  %v85_v3 = vpop.permute.xlu0 %84  ;;  %v88_v4 = vpop.permute.xlu1 %87 }
  0xaf   :  { %767 = vmatmul.mubr.msk.f32.gmra.mrb[12].mxu0 %vm119_vm10, %v1102_v55  ;;  %799 = vmatmul.mubr.msk.f32.gmra.mrb[12].mxu1 %vm121_vm11, %v1102_v55  ;;  %vm135_vm10 = vcmp.eq.s32.totalorder %v79_v1, %v1182_v50  ;;  %vm137_vm11 = vcmp.eq.s32.totalorder %v79_v1, %v1191_v53 }
  0xb0   :  { %768 = vmatprep.mubr.msk.f32.mxu0 %vm124_vm12, %v1102_v55  ;;  %800 = vmatprep.mubr.msk.f32.mxu1 %vm126_vm13, %v1102_v55  ;;  %vm140_vm12 = vcmp.eq.s32.totalorder %v82_v2, %v1185_v51  ;;  %vm142_vm13 = vcmp.eq.s32.totalorder %v82_v2, %v1188_v52  ;;  %v91_v5 = vpop.permute.xlu0 %90  ;;  %v94_v6 = vpop.permute.xlu1 %93 }
  0xb3   :  { %769 = vmatmul.mubr.msk.f32.gmra.mrb[14].mxu0 %vm123_vm14, %v1102_v55  ;;  %801 = vmatmul.mubr.msk.f32.gmra.mrb[14].mxu1 %vm125_vm15, %v1102_v55  ;;  %vm139_vm14 = vcmp.eq.s32.totalorder %v82_v2, %v1182_v50  ;;  %vm141_vm15 = vcmp.eq.s32.totalorder %v82_v2, %v1191_v53 }
  0xb4   :  { %770 = vmatprep.mubr.msk.f32.mxu0 %vm128_vm0, %v1102_v55  ;;  %802 = vmatprep.mubr.msk.f32.mxu1 %vm130_vm1, %v1102_v55  ;;  %vm144_vm0 = vcmp.eq.s32.totalorder %v85_v3, %v1185_v51  ;;  %vm146_vm1 = vcmp.eq.s32.totalorder %v85_v3, %v1188_v52 }
  0xb7   :  { %771 = vmatmul.mubr.msk.f32.gmra.mrb[16].mxu0 %vm127_vm2, %v1102_v55  ;;  %803 = vmatmul.mubr.msk.f32.gmra.mrb[16].mxu1 %vm129_vm3, %v1102_v55  ;;  %vm143_vm2 = vcmp.eq.s32.totalorder %v85_v3, %v1182_v50  ;;  %vm145_vm3 = vcmp.eq.s32.totalorder %v85_v3, %v1191_v53 }
  0xb8   :  { %772 = vmatprep.mubr.msk.f32.mxu0 %vm132_vm4, %v1102_v55  ;;  %804 = vmatprep.mubr.msk.f32.mxu1 %vm134_vm5, %v1102_v55  ;;  %vm148_vm4 = vcmp.eq.s32.totalorder %v88_v4, %v1185_v51  ;;  %vm150_vm5 = vcmp.eq.s32.totalorder %v88_v4, %v1188_v52 }
  0xbb   :  { %773 = vmatmul.mubr.msk.f32.gmra.mrb[18].mxu0 %vm131_vm6, %v1102_v55  ;;  %805 = vmatmul.mubr.msk.f32.gmra.mrb[18].mxu1 %vm133_vm7, %v1102_v55  ;;  %vm147_vm6 = vcmp.eq.s32.totalorder %v88_v4, %v1182_v50  ;;  %vm149_vm7 = vcmp.eq.s32.totalorder %v88_v4, %v1191_v53 }
  0xbc   :  { %774 = vmatprep.mubr.msk.f32.mxu0 %vm136_vm8, %v1102_v55  ;;  %806 = vmatprep.mubr.msk.f32.mxu1 %vm138_vm9, %v1102_v55  ;;  %vm152_vm8 = vcmp.eq.s32.totalorder %v91_v5, %v1185_v51  ;;  %vm154_vm9 = vcmp.eq.s32.totalorder %v91_v5, %v1188_v52 }
  0xbf   :  { %775 = vmatmul.mubr.msk.f32.gmra.mrb[20].mxu0 %vm135_vm10, %v1102_v55  ;;  %807 = vmatmul.mubr.msk.f32.gmra.mrb[20].mxu1 %vm137_vm11, %v1102_v55  ;;  %vm151_vm10 = vcmp.eq.s32.totalorder %v91_v5, %v1182_v50  ;;  %vm153_vm11 = vcmp.eq.s32.totalorder %v91_v5, %v1191_v53 }
  0xc0   :  { %776 = vmatprep.mubr.msk.f32.mxu0 %vm140_vm12, %v1102_v55  ;;  %808 = vmatprep.mubr.msk.f32.mxu1 %vm142_vm13, %v1102_v55  ;;  %vm156_vm12 = vcmp.eq.s32.totalorder %v94_v6, %v1185_v51  ;;  %vm158_vm13 = vcmp.eq.s32.totalorder %v94_v6, %v1188_v52 }
  0xc3   :  { %777 = vmatmul.mubr.msk.f32.gmra.mrb[22].mxu0 %vm139_vm14, %v1102_v55  ;;  %809 = vmatmul.mubr.msk.f32.gmra.mrb[22].mxu1 %vm141_vm15, %v1102_v55  ;;  %vm155_vm14 = vcmp.eq.s32.totalorder %v94_v6, %v1182_v50  ;;  %vm157_vm15 = vcmp.eq.s32.totalorder %v94_v6, %v1191_v53 }
  0xc4   :  { %778 = vmatprep.mubr.msk.f32.mxu0 %vm144_vm0, %v1102_v55  ;;  %810 = vmatprep.mubr.msk.f32.mxu1 %vm146_vm1, %v1102_v55 }
  0xc7   :  { %779 = vmatmul.mubr.msk.f32.gmra.mrb[24].mxu0 %vm143_vm2, %v1102_v55  ;;  %811 = vmatmul.mubr.msk.f32.gmra.mrb[24].mxu1 %vm145_vm3, %v1102_v55 }
  0xc8   :  { %780 = vmatprep.mubr.msk.f32.mxu0 %vm148_vm4, %v1102_v55  ;;  %812 = vmatprep.mubr.msk.f32.mxu1 %vm150_vm5, %v1102_v55 }
  0xcb   :  { %781 = vmatmul.mubr.msk.f32.gmra.mrb[26].mxu0 %vm147_vm6, %v1102_v55  ;;  %813 = vmatmul.mubr.msk.f32.gmra.mrb[26].mxu1 %vm149_vm7, %v1102_v55 }
  0xcc   :  { %782 = vmatprep.mubr.msk.f32.mxu0 %vm152_vm8, %v1102_v55  ;;  %814 = vmatprep.mubr.msk.f32.mxu1 %vm154_vm9, %v1102_v55 }
  0xcf   :  { %783 = vmatmul.mubr.msk.f32.gmra.mrb[28].mxu0 %vm151_vm10, %v1102_v55  ;;  %815 = vmatmul.mubr.msk.f32.gmra.mrb[28].mxu1 %vm153_vm11, %v1102_v55 }
  0xd0   :  { %784 = vmatprep.mubr.msk.f32.mxu0 %vm156_vm12, %v1102_v55  ;;  %816 = vmatprep.mubr.msk.f32.mxu1 %vm158_vm13, %v1102_v55 }
  0xd3   :  { %785 = vmatmul.mubr.msk.f32.gmra.mrb[30].mxu0 %vm155_vm14, %v1102_v55  ;;  %817 = vmatmul.mubr.msk.f32.gmra.mrb[30].mxu1 %vm157_vm15, %v1102_v55 }
 0x16a   :  { %v850_v7 = vpop.f32.mrb[0].mxu0  ;;  %v930_v8 = vpop.f32.mrb[0].mxu1 }
 0x16b   :  { %v851_v9 = vpop.f32.mrb[1].mxu0  ;;  %v931_v10 = vpop.f32.mrb[1].mxu1 }
 0x16c   :  { %v852_v11 = vadd.f32 %v851_v9, %v850_v7  ;;  %v932_v12 = vadd.f32 %v931_v10, %v930_v8 }
 0x16e   :  { %v563_v13 = vadd.f32 %v932_v12, %v852_v11  ;;  %v853_v14 = vpop.f32.mrb[2].mxu0  ;;  %v933_v15 = vpop.f32.mrb[2].mxu1 }
 0x16f   :  { %v854_v16 = vpop.f32.mrb[3].mxu0  ;;  %v934_v17 = vpop.f32.mrb[3].mxu1 }
 0x170   :  { %v641_v18 = vmul.f32 11.313708, %v563_v13  ;;  %v855_v19 = vadd.f32 %v854_v16, %v853_v14  ;;  %v935_v20 = vadd.f32 %v934_v17, %v933_v15 }
 0x172   :  { %657 = vst [vmem:[#allocation5] sm:$0xff] %v641_v18  ;;  %v568_v21 = vadd.f32 %v935_v20, %v855_v19  ;;  %v856_v22 = vpop.f32.mrb[4].mxu0  ;;  %v936_v23 = vpop.f32.mrb[4].mxu1 }
 0x173   :  { %v857_v24 = vpop.f32.mrb[5].mxu0  ;;  %v937_v25 = vpop.f32.mrb[5].mxu1 }
 0x174   :  { %v642_v26 = vmul.f32 11.313708, %v568_v21  ;;  %v858_v27 = vadd.f32 %v857_v24, %v856_v22  ;;  %v938_v28 = vadd.f32 %v937_v25, %v936_v23 }
 0x176   :  { %658 = vst [vmem:[#allocation5 + $0x8] sm:$0xff] %v642_v26  ;;  %v573_v29 = vadd.f32 %v938_v28, %v858_v27  ;;  %v859_v30 = vpop.f32.mrb[6].mxu0  ;;  %v939_v31 = vpop.f32.mrb[6].mxu1 }
 0x177   :  { %v860_v32 = vpop.f32.mrb[7].mxu0  ;;  %v940_v33 = vpop.f32.mrb[7].mxu1 }
 0x178   :  { %v643_v34 = vmul.f32 11.313708, %v573_v29  ;;  %v861_v35 = vadd.f32 %v860_v32, %v859_v30  ;;  %v941_v36 = vadd.f32 %v940_v33, %v939_v31 }
 0x17a   :  { %659 = vst [vmem:[#allocation5 + $0x10] sm:$0xff] %v643_v34  ;;  %v578_v37 = vadd.f32 %v941_v36, %v861_v35  ;;  %v862_v38 = vpop.f32.mrb[8].mxu0  ;;  %v942_v39 = vpop.f32.mrb[8].mxu1 }
 0x17b   :  { %v863_v40 = vpop.f32.mrb[9].mxu0  ;;  %v943_v41 = vpop.f32.mrb[9].mxu1 }
 0x17c   :  { %v644_v42 = vmul.f32 11.313708, %v578_v37  ;;  %v864_v43 = vadd.f32 %v863_v40, %v862_v38  ;;  %v944_v44 = vadd.f32 %v943_v41, %v942_v39 }
 0x17e   :  { %660 = vst [vmem:[#allocation5 + $0x18] sm:$0xff] %v644_v42  ;;  %v583_v45 = vadd.f32 %v944_v44, %v864_v43  ;;  %v865_v46 = vpop.f32.mrb[10].mxu0  ;;  %v945_v47 = vpop.f32.mrb[10].mxu1 }
 0x17f   :  { %v866_v48 = vpop.f32.mrb[11].mxu0  ;;  %v946_v49 = vpop.f32.mrb[11].mxu1 }
 0x180   :  { %v645_v50 = vmul.f32 11.313708, %v583_v45  ;;  %v867_v51 = vadd.f32 %v866_v48, %v865_v46  ;;  %v947_v52 = vadd.f32 %v946_v49, %v945_v47 }
 0x182   :  { %661 = vst [vmem:[#allocation5 + $0x20] sm:$0xff] %v645_v50  ;;  %v588_v53 = vadd.f32 %v947_v52, %v867_v51  ;;  %v868_v54 = vpop.f32.mrb[12].mxu0  ;;  %v948_v55 = vpop.f32.mrb[12].mxu1 }
 0x183   :  { %v869_v56 = vpop.f32.mrb[13].mxu0  ;;  %v949_v57 = vpop.f32.mrb[13].mxu1 }
 0x184   :  { %v646_v58 = vmul.f32 11.313708, %v588_v53  ;;  %v870_v59 = vadd.f32 %v869_v56, %v868_v54  ;;  %v950_v60 = vadd.f32 %v949_v57, %v948_v55 }
 0x186   :  { %662 = vst [vmem:[#allocation5 + $0x28] sm:$0xff] %v646_v58  ;;  %v593_v61 = vadd.f32 %v950_v60, %v870_v59  ;;  %v871_v62 = vpop.f32.mrb[14].mxu0  ;;  %v951_v63 = vpop.f32.mrb[14].mxu1 }
 0x187   :  { %v872_v0 = vpop.f32.mrb[15].mxu0  ;;  %v952_v1 = vpop.f32.mrb[15].mxu1 }
 0x188   :  { %v647_v2 = vmul.f32 11.313708, %v593_v61  ;;  %v873_v3 = vadd.f32 %v872_v0, %v871_v62  ;;  %v953_v4 = vadd.f32 %v952_v1, %v951_v63 }
 0x18a   :  { %663 = vst [vmem:[#allocation5 + $0x30] sm:$0xff] %v647_v2  ;;  %v598_v5 = vadd.f32 %v953_v4, %v873_v3  ;;  %v874_v6 = vpop.f32.mrb[16].mxu0  ;;  %v954_v7 = vpop.f32.mrb[16].mxu1 }
 0x18b   :  { %v875_v8 = vpop.f32.mrb[17].mxu0  ;;  %v955_v9 = vpop.f32.mrb[17].mxu1 }
 0x18c   :  { %v648_v10 = vmul.f32 11.313708, %v598_v5  ;;  %v876_v11 = vadd.f32 %v875_v8, %v874_v6  ;;  %v956_v12 = vadd.f32 %v955_v9, %v954_v7 }
 0x18e   :  { %664 = vst [vmem:[#allocation5 + $0x38] sm:$0xff] %v648_v10  ;;  %v603_v13 = vadd.f32 %v956_v12, %v876_v11  ;;  %v877_v14 = vpop.f32.mrb[18].mxu0  ;;  %v957_v15 = vpop.f32.mrb[18].mxu1 }
 0x18f   :  { %v878_v16 = vpop.f32.mrb[19].mxu0  ;;  %v958_v17 = vpop.f32.mrb[19].mxu1 }
 0x190   :  { %v649_v18 = vmul.f32 11.313708, %v603_v13  ;;  %v879_v19 = vadd.f32 %v878_v16, %v877_v14  ;;  %v959_v20 = vadd.f32 %v958_v17, %v957_v15 }
 0x192   :  { %665 = vst [vmem:[#allocation5 + $0x40] sm:$0xff] %v649_v18  ;;  %v608_v21 = vadd.f32 %v959_v20, %v879_v19  ;;  %v880_v22 = vpop.f32.mrb[20].mxu0  ;;  %v960_v23 = vpop.f32.mrb[20].mxu1 }
 0x193   :  { %v881_v24 = vpop.f32.mrb[21].mxu0  ;;  %v961_v25 = vpop.f32.mrb[21].mxu1 }
 0x194   :  { %v650_v26 = vmul.f32 11.313708, %v608_v21  ;;  %v882_v27 = vadd.f32 %v881_v24, %v880_v22  ;;  %v962_v28 = vadd.f32 %v961_v25, %v960_v23 }
 0x196   :  { %666 = vst [vmem:[#allocation5 + $0x48] sm:$0xff] %v650_v26  ;;  %v613_v29 = vadd.f32 %v962_v28, %v882_v27  ;;  %v883_v30 = vpop.f32.mrb[22].mxu0  ;;  %v963_v31 = vpop.f32.mrb[22].mxu1 }
 0x197   :  { %v884_v32 = vpop.f32.mrb[23].mxu0  ;;  %v964_v33 = vpop.f32.mrb[23].mxu1 }
 0x198   :  { %v651_v34 = vmul.f32 11.313708, %v613_v29  ;;  %v885_v35 = vadd.f32 %v884_v32, %v883_v30  ;;  %v965_v36 = vadd.f32 %v964_v33, %v963_v31 }
 0x19a   :  { %667 = vst [vmem:[#allocation5 + $0x50] sm:$0xff] %v651_v34  ;;  %v618_v37 = vadd.f32 %v965_v36, %v885_v35  ;;  %v886_v38 = vpop.f32.mrb[24].mxu0  ;;  %v966_v39 = vpop.f32.mrb[24].mxu1 }
 0x19b   :  { %v887_v40 = vpop.f32.mrb[25].mxu0  ;;  %v967_v41 = vpop.f32.mrb[25].mxu1 }
 0x19c   :  { %v652_v42 = vmul.f32 11.313708, %v618_v37  ;;  %v888_v43 = vadd.f32 %v887_v40, %v886_v38  ;;  %v968_v44 = vadd.f32 %v967_v41, %v966_v39 }
 0x19e   :  { %668 = vst [vmem:[#allocation5 + $0x58] sm:$0xff] %v652_v42  ;;  %v623_v45 = vadd.f32 %v968_v44, %v888_v43  ;;  %v889_v46 = vpop.f32.mrb[26].mxu0  ;;  %v969_v47 = vpop.f32.mrb[26].mxu1 }
 0x19f   :  { %v890_v48 = vpop.f32.mrb[27].mxu0  ;;  %v970_v49 = vpop.f32.mrb[27].mxu1 }
 0x1a0   :  { %v653_v50 = vmul.f32 11.313708, %v623_v45  ;;  %v891_v51 = vadd.f32 %v890_v48, %v889_v46  ;;  %v971_v52 = vadd.f32 %v970_v49, %v969_v47 }
 0x1a2   :  { %669 = vst [vmem:[#allocation5 + $0x60] sm:$0xff] %v653_v50  ;;  %v628_v53 = vadd.f32 %v971_v52, %v891_v51  ;;  %v892_v54 = vpop.f32.mrb[28].mxu0  ;;  %v972_v55 = vpop.f32.mrb[28].mxu1 }
 0x1a3   :  { %v893_v56 = vpop.f32.mrb[29].mxu0  ;;  %v973_v57 = vpop.f32.mrb[29].mxu1 }
 0x1a4   :  { %v654_v58 = vmul.f32 11.313708, %v628_v53  ;;  %v894_v59 = vadd.f32 %v893_v56, %v892_v54  ;;  %v974_v60 = vadd.f32 %v973_v57, %v972_v55 }
 0x1a6   :  { %670 = vst [vmem:[#allocation5 + $0x68] sm:$0xff] %v654_v58  ;;  %v633_v61 = vadd.f32 %v974_v60, %v894_v59  ;;  %v895_v62 = vpop.f32.mrb[30].mxu0  ;;  %v975_v63 = vpop.f32.mrb[30].mxu1 }
 0x1a7   :  { %v896_v0 = vpop.f32.mrb[31].mxu0  ;;  %v976_v1 = vpop.f32.mrb[31].mxu1 }
 0x1a8   :  { %v655_v2 = vmul.f32 11.313708, %v633_v61  ;;  %v897_v3 = vadd.f32 %v896_v0, %v895_v62  ;;  %v977_v4 = vadd.f32 %v976_v1, %v975_v63 }
 0x1aa   :  { %671 = vst [vmem:[#allocation5 + $0x70] sm:$0xff] %v655_v2  ;;  %v638_v5 = vadd.f32 %v977_v4, %v897_v3 }
 0x1ac   :  { %v656_v6 = vmul.f32 11.313708, %v638_v5 }
 0x1ae   :  { %672 = vst [vmem:[#allocation5 + $0x78] sm:$0xff] %v656_v6 }
 0x1af   :  { %1083 = shalt.err (!%p1080_p12)
}
 0x1b0   :  { %s1084_s3 = scalar_lea.hbm %s1338_s2, 2048 }
 0x1b1   :  { %p1085_p13 = scmp.ne.s32.totalorder %s1338_s2, %s1084_s3  ;;  %p1088_p0 = scmp.lt.u32.totalorder %s1084_s3, %s1338_s2 }
 0x1b3   :  { %p1090_p1 = pnand %p1088_p0, %p1085_p13 }
 0x1b5   :  { %1093 = shalt.err (!%p1090_p1)
}
 0x1b6   :  { %684 = dma.vmem_to_hbm [thread:$0]  %s679_s28, 2048, %s1338_s2, [#allocation4], %s1099_s19, %s1099_s19, %s1100_s20  }
 0x1b7   :  { %1096 = dma.done.wait [#allocation4], 2048  }
 0x1b8   :  { %1097 = vsyncadd [#allocation4], 4294965248 }
 0x1b9   :  { %688 = vsyncpa [#allocation3], 1 }
 0x1ba   :  { %689 = vsyncpa [#allocation4], 1 }

</bundles_post_ra>
